<compile_context>
chip_gen: v7x
topology: tpu7x:2x2x1
jax: 0.10.0
libtpu: 0.0.40
codegen_flags: <defaults>
</compile_context>

<pallas_src>
import functools

import jax
import jax.numpy as jnp
import numpy as np
from jax import lax
from jax.experimental import pallas as pl
from jax.experimental.pallas import tpu as pltpu


def _cross_attn_kernel(x_ref, ctx_ref, wq_ref, wkv_ref, wo_ref, bo_ref, o_ref,
                       *, heads, dim_head, scale):
    """One grid step processes a block of `bblk` batches.

    x_ref  : (bblk, Nq, Dq)  bf16    ctx_ref: (bblk, Nc, Dq)  bf16
    wq_ref : (inner, Dq)     bf16    wkv_ref: (2*inner, Dq)   bf16   (PyTorch (out, in))
    wo_ref : (Dq, inner)     bf16    bo_ref : (1, Dq)         f32
    o_ref  : (bblk, Nq, Dq)
    """
    bblk, nq, dq = x_ref.shape
    nc = ctx_ref.shape[1]
    inner = heads * dim_head
    # Contract the activation's dim 1 with the weight's "in" dim (i.e. x @ W^T); the MXU
    # consumes the transposed operand directly, so no host-side weight transposes.
    dn_t = (((1,), (1,)), ((), ()))

    # Flatten the batch block into the matmul M dimension (leading-dim merge only).
    xf = x_ref[...].reshape(bblk * nq, dq)                               # (bblk*Nq, Dq) bf16
    cf = ctx_ref[...].reshape(bblk * nc, dq)                             # (bblk*Nc, Dq) bf16

    # Projections: bf16 operands, f32 accumulation.  Softmax scale folded into q.
    q = lax.dot_general(xf, wq_ref[...], dn_t,
                        preferred_element_type=jnp.float32) * scale      # (bblk*Nq, inner) f32
    q = q.astype(jnp.bfloat16).reshape(bblk, nq, inner)
    kv = lax.dot_general(cf, wkv_ref[...], dn_t,
                         preferred_element_type=jnp.float32)             # (bblk*Nc, 2*inner) f32
    kv = kv.astype(jnp.bfloat16).reshape(bblk, nc, 2 * inner)
    k = kv[:, :, :inner]                                                 # (bblk, Nc, inner) bf16
    v = kv[:, :, inner:]                                                 # (bblk, Nc, inner) bf16

    # Compile-time 0/1 lane masks selecting each head's dim_head-wide slice of `inner`.
    lane = lax.broadcasted_iota(jnp.int32, (1, 1, inner), 2)

    # Heads-concatenated attention output, accumulated directly in (b n (h d)) layout.
    acc = jnp.zeros((bblk, nq, inner), jnp.float32)
    # `heads` is a small compile-time constant: the static loop is fully unrolled and every
    # mask is a constant — no dynamic or sub-vreg lane slicing anywhere in the loop body.
    for h in range(heads):
        sel = jnp.logical_and(lane >= h * dim_head, lane < (h + 1) * dim_head)
        qh = q * sel.astype(q.dtype)                                     # zero other heads' lanes
        # Full-width (K=inner) contraction; zeroed lanes contribute nothing, so this equals
        # the per-head q_h k_h^T without 16-lane slices or K=16 MXU passes.
        sim = jnp.einsum('bqd,bkd->bqk', qh, k,
                         preferred_element_type=jnp.float32)             # (bblk, Nq, Nc) f32
        m = jnp.max(sim, axis=-1, keepdims=True)
        p = jnp.exp(sim - m)                                             # f32 softmax (v5e-safe)
        r = pl.reciprocal(jnp.sum(p, axis=-1, keepdims=True), approx=True)
        ph = (p * r).astype(jnp.bfloat16)                                # probs -> bf16 for MXU
        oh = jnp.einsum('bqk,bkd->bqd', ph, v,
                        preferred_element_type=jnp.float32)              # (bblk, Nq, inner) f32
        acc = acc + oh * sel.astype(oh.dtype)                            # keep head-h lanes only

    # Single K=inner output projection over the concatenated heads, plus bias.
    of = acc.astype(jnp.bfloat16).reshape(bblk * nq, inner)
    out = lax.dot_general(of, wo_ref[...], dn_t,
                          preferred_element_type=jnp.float32)            # (bblk*Nq, Dq) f32
    out = out + bo_ref[...]
    o_ref[...] = out.reshape(bblk, nq, dq).astype(o_ref.dtype)


def _vmem_plan():
    """(chooser budget, explicit scoped vmem_limit_bytes) for the current TPU generation."""
    try:
        cap = int(pltpu.get_tpu_info().vmem_capacity_bytes)
    except Exception:                       # unknown chip / query unavailable
        cap = 64 << 20                      # assume the smallest (v7x-sized) VMEM
    budget = max(16 << 20, min(int(cap * 0.40), 64 << 20))   # ~51 MiB v5e/v6e, ~25 MiB v7x
    limit = min(int(cap * 0.75), 96 << 20)                    # scoped limit, generous headroom
    return budget, limit


def _pick_block_batches(B, Nq, Nc, Dq, inner, *, row_target=1024, vmem_budget=24 << 20):
    """Largest divisor of B such that (a) the projections see <= row_target matmul rows,
    (b) the block plus intermediates fits the per-generation VMEM budget, and (c) the grid
    keeps >= 2 steps (needed for v7x's two TensorCores; ~free elsewhere)."""
    def block_bytes(d):
        io = 2 * d * (Nq * Dq * 2 + Nc * Dq * 2 + Nq * Dq * 4)   # dbl-buffered x/ctx (bf16) + out (f32)
        inter = d * (Nq * inner * 2            # q (bf16)
                     + Nc * 2 * inner * 2      # k, v (bf16)
                     + Nq * inner * 4          # acc (f32)
                     + 2 * Nq * Nc * 4         # sim, p (f32)
                     + Nq * inner * 4          # per-head p@v result (f32)
                     + Nq * Dq * 4)            # projected out (f32)
        return io + 2 * inter                  # 2x fudge on intermediates / vreg spill slack
    best = 1
    for d in range(1, B + 1):
        if B % d:
            continue
        if B >= 2 and B // d < 2:              # keep at least 2 grid steps
            continue
        if d * Nq > row_target or block_bytes(d) > vmem_budget:
            continue
        best = d
    return best


def cross_attention(x, context, params, *, heads, dim_head, block_batches=None):
    """x: (B, Nq, Dq), context: (B, Nc, Dq). Returns (B, Nq, Dq) in x.dtype."""
    B, Nq, Dq = x.shape
    _, Nc, _ = context.shape
    inner = heads * dim_head
    scale = float(dim_head) ** -0.5

    # bf16 operands for the MXU (and half the per-block DMA bytes).  Weights keep the
    # PyTorch nn.Linear (out, in) layout; the kernel contracts against their "in" dim.
    xb = x.astype(jnp.bfloat16)
    cb = context.astype(jnp.bfloat16)
    wq = params["to_q_w"].astype(jnp.bfloat16)            # (inner, Dq)
    wkv = params["to_kv_w"].astype(jnp.bfloat16)          # (2*inner, Dq): k first chunk, v second
    wo = params["to_out_w"].astype(jnp.bfloat16)          # (Dq, inner)
    bo = params["to_out_b"].astype(jnp.float32).reshape(1, Dq)

    budget, vmem_limit = _vmem_plan()
    bblk = (block_batches if block_batches is not None
            else _pick_block_batches(B, Nq, Nc, Dq, inner, row_target=1024, vmem_budget=budget))
    grid = pl.cdiv(B, bblk)                               # default chooser always divides B

    kernel = functools.partial(_cross_attn_kernel,
                               heads=heads, dim_head=dim_head, scale=scale)

    return pl.pallas_call(
        kernel,
        out_shape=jax.ShapeDtypeStruct((B, Nq, Dq), x.dtype),
        grid_spec=pltpu.PrefetchScalarGridSpec(
            num_scalar_prefetch=0,
            grid=(grid,),
            in_specs=[
                pl.BlockSpec((bblk, Nq, Dq), lambda b: (b, 0, 0)),       # x block
                pl.BlockSpec((bblk, Nc, Dq), lambda b: (b, 0, 0)),       # context block
                pl.BlockSpec((inner, Dq), lambda b: (0, 0)),             # Wq
                pl.BlockSpec((2 * inner, Dq), lambda b: (0, 0)),         # Wkv (fused)
                pl.BlockSpec((Dq, inner), lambda b: (0, 0)),             # Wo
                pl.BlockSpec((1, Dq), lambda b: (0, 0)),                 # bo
            ],
            out_specs=pl.BlockSpec((bblk, Nq, Dq), lambda b: (b, 0, 0)),
        ),
        compiler_params=pltpu.CompilerParams(
            dimension_semantics=("parallel",),
            vmem_limit_bytes=vmem_limit,
        ),
    )(xb, cb, wq, wkv, wo, bo)


def _reference(x, context, params, *, heads, dim_head):
    """Pure-JAX f32 reference mirroring the PyTorch forward exactly."""
    inner = heads * dim_head
    scale = float(dim_head) ** -0.5
    B, Nq, Dq = x.shape
    q = x @ params["to_q_w"].T                                   # (B, Nq, inner)
    kv = context @ params["to_kv_w"].T                           # (B, Nc, 2*inner)
    k, v = kv[..., :inner], kv[..., inner:]

    def split_heads(t):  # b n (h d) -> (b h) n d
        b, n, _ = t.shape
        return t.reshape(b, n, heads, dim_head).transpose(0, 2, 1, 3).reshape(b * heads, n, dim_head)

    q, k, v = map(split_heads, (q, k, v))
    sim = jnp.einsum("bid,bjd->bij", q, k) * scale
    attn = jax.nn.softmax(sim, axis=-1)
    out = jnp.einsum("bij,bjd->bid", attn, v)
    out = out.reshape(B, heads, Nq, dim_head).transpose(0, 2, 1, 3).reshape(B, Nq, inner)
    return out @ params["to_out_w"].T + params["to_out_b"]


if __name__ == "__main__":
    # Small, module-consistent shapes.
    B, Nq, Nc = 2, 8, 16
    query_dim, heads, dim_head = 32, 4, 16
    inner = heads * dim_head

    key = jax.random.PRNGKey(0)
    kx, kc, k1, k2, k3, k4 = jax.random.split(key, 6)

    x = jax.random.normal(kx, (B, Nq, query_dim), dtype=jnp.float32)
    context = jax.random.normal(kc, (B, Nc, query_dim), dtype=jnp.float32)

    # Deterministic parameter init (PyTorch-Linear-style uniform bounds).
    def uinit(k, shape, fan_in):
        bound = 1.0 / np.sqrt(fan_in)
        return jax.random.uniform(k, shape, jnp.float32, -bound, bound)

    params = {
        "to_q_w": uinit(k1, (inner, query_dim), query_dim),        # nn.Linear(query_dim, inner, bias=False)
        "to_kv_w": uinit(k2, (2 * inner, query_dim), query_dim),   # nn.Linear(query_dim, 2*inner, bias=False)
        "to_out_w": uinit(k3, (query_dim, inner), inner),          # nn.Linear(inner, query_dim)
        "to_out_b": uinit(k4, (query_dim,), inner),
    }

    out = cross_attention(x, context, params, heads=heads, dim_head=dim_head)
    out = jax.block_until_ready(out)

    ref = _reference(x, context, params, heads=heads, dim_head=dim_head)
    # Tolerance accounts for bf16 MXU operands (f32 accumulation) and the hardware approx
    # reciprocal in the softmax denominator; real bugs would be orders of magnitude larger.
    np.testing.assert_allclose(np.asarray(out), np.asarray(ref), rtol=3e-2, atol=3e-2)

    print("KERNEL_OK")
</pallas_src>

<mosaic_0001>
module attributes {stable_mosaic.version = 11 : i64} {
  func.func @_cross_attn_kernel(%arg0: i32, %arg1: memref<1x8x32xbf16, #tpu.memory_space<vmem>>, %arg2: memref<1x16x32xbf16, #tpu.memory_space<vmem>>, %arg3: memref<64x32xbf16, #tpu.memory_space<vmem>>, %arg4: memref<128x32xbf16, #tpu.memory_space<vmem>>, %arg5: memref<32x64xbf16, #tpu.memory_space<vmem>>, %arg6: memref<1x32xf32, #tpu.memory_space<vmem>>, %arg7: memref<1x8x32xf32, #tpu.memory_space<vmem>>) attributes {dimension_semantics = [#tpu.dimension_semantics<parallel>], iteration_bounds = array<i64: 2>, scalar_prefetch = 0 : i64, scratch_operands = 0 : i64, tpu.core_type = #tpu.core_type<tc>, window_params = [{transform_indices = @transform_0, window_bounds = array<i64: 1, 8, 32>}, {transform_indices = @transform_1, window_bounds = array<i64: 1, 16, 32>}, {pipeline_mode = #tpu.pipeline_mode<synchronous>, transform_indices = @transform_2, window_bounds = array<i64: 64, 32>}, {pipeline_mode = #tpu.pipeline_mode<synchronous>, transform_indices = @transform_3, window_bounds = array<i64: 128, 32>}, {pipeline_mode = #tpu.pipeline_mode<synchronous>, transform_indices = @transform_4, window_bounds = array<i64: 32, 64>}, {pipeline_mode = #tpu.pipeline_mode<synchronous>, transform_indices = @transform_5, window_bounds = array<i64: 1, 32>}, {transform_indices = @transform_6, window_bounds = array<i64: 1, 8, 32>}]} {
    %c0 = arith.constant 0 : index
    %c0_0 = arith.constant 0 : index
    %c0_1 = arith.constant 0 : index
    %0 = vector.load %arg1[%c0, %c0_0, %c0_1] : memref<1x8x32xbf16, #tpu.memory_space<vmem>>, vector<1x8x32xbf16>
    %1 = vector.shape_cast %0 : vector<1x8x32xbf16> to vector<8x32xbf16>
    %c0_2 = arith.constant 0 : index
    %c0_3 = arith.constant 0 : index
    %c0_4 = arith.constant 0 : index
    %2 = vector.load %arg2[%c0_2, %c0_3, %c0_4] : memref<1x16x32xbf16, #tpu.memory_space<vmem>>, vector<1x16x32xbf16>
    %3 = vector.shape_cast %2 : vector<1x16x32xbf16> to vector<16x32xbf16>
    %c0_5 = arith.constant 0 : index
    %c0_6 = arith.constant 0 : index
    %4 = vector.load %arg3[%c0_5, %c0_6] : memref<64x32xbf16, #tpu.memory_space<vmem>>, vector<64x32xbf16>
    %cst = arith.constant dense<0.000000e+00> : vector<8x64xf32>
    %5 = tpu.matmul %1, %4, %cst {dimension_numbers = #tpu.dot_dimension_numbers<[1], [1], [0], [0], [0, 0, 1, 0], [], []>} : vector<8x32xbf16>, vector<64x32xbf16>, vector<8x64xf32> -> vector<8x64xf32>
    %cst_7 = arith.constant 2.500000e-01 : f32
    %6 = vector.broadcast %cst_7 : f32 to vector<8x64xf32>
    %7 = arith.mulf %5, %6 : vector<8x64xf32>
    %8 = arith.truncf %7 : vector<8x64xf32> to vector<8x64xbf16>
    %9 = vector.shape_cast %8 : vector<8x64xbf16> to vector<1x8x64xbf16>
    %c0_8 = arith.constant 0 : index
    %c0_9 = arith.constant 0 : index
    %10 = vector.load %arg4[%c0_8, %c0_9] : memref<128x32xbf16, #tpu.memory_space<vmem>>, vector<128x32xbf16>
    %cst_10 = arith.constant dense<0.000000e+00> : vector<16x128xf32>
    %11 = tpu.matmul %3, %10, %cst_10 {dimension_numbers = #tpu.dot_dimension_numbers<[1], [1], [0], [0], [0, 0, 1, 0], [], []>} : vector<16x32xbf16>, vector<128x32xbf16>, vector<16x128xf32> -> vector<16x128xf32>
    %12 = arith.truncf %11 : vector<16x128xf32> to vector<16x128xbf16>
    %13 = vector.shape_cast %12 : vector<16x128xbf16> to vector<1x16x128xbf16>
    %14 = vector.extract_strided_slice %13 {offsets = [0, 0, 0], sizes = [1, 16, 64], strides = [1, 1, 1]} : vector<1x16x128xbf16> to vector<1x16x64xbf16>
    %15 = vector.extract_strided_slice %13 {offsets = [0, 0, 64], sizes = [1, 16, 64], strides = [1, 1, 1]} : vector<1x16x128xbf16> to vector<1x16x64xbf16>
    %16 = tpu.iota {dimensions = array<i32: 2>} : vector<1x1x64xi32>
    %cst_11 = arith.constant 0.000000e+00 : f32
    %17 = vector.broadcast %cst_11 : f32 to vector<1x8x64xf32>
    %c0_i32 = arith.constant 0 : i32
    %18 = vector.broadcast %c0_i32 : i32 to vector<1x1x64xi32>
    %19 = arith.cmpi sge, %16, %18 : vector<1x1x64xi32>
    %c16_i32 = arith.constant 16 : i32
    %20 = vector.broadcast %c16_i32 : i32 to vector<1x1x64xi32>
    %21 = arith.cmpi slt, %16, %20 : vector<1x1x64xi32>
    %22 = arith.andi %19, %21 : vector<1x1x64xi1>
    %23 = arith.extui %22 : vector<1x1x64xi1> to vector<1x1x64xi32>
    %24 = arith.sitofp %23 : vector<1x1x64xi32> to vector<1x1x64xf32>
    %25 = arith.truncf %24 : vector<1x1x64xf32> to vector<1x1x64xbf16>
    %26 = vector.broadcast %25 : vector<1x1x64xbf16> to vector<1x8x64xbf16>
    %27 = arith.mulf %9, %26 : vector<1x8x64xbf16>
    "tpu.trace_start"() <{level = 10 : i32, message = "bqd,bkd->bqk"}> : () -> ()
    %cst_12 = arith.constant dense<0.000000e+00> : vector<1x8x16xf32>
    %28 = tpu.matmul %27, %14, %cst_12 {dimension_numbers = #tpu.dot_dimension_numbers<[2], [2], [1], [1], [0, 0, 0, 1, 1, 1], [0], [0]>} : vector<1x8x64xbf16>, vector<1x16x64xbf16>, vector<1x8x16xf32> -> vector<1x8x16xf32>
    "tpu.trace_stop"() : () -> ()
    %cst_13 = arith.constant dense<0xFF800000> : vector<1x8xf32>
    %29 = vector.multi_reduction <maximumf>, %28, %cst_13 [2] : vector<1x8x16xf32> to vector<1x8xf32>
    %30 = vector.shape_cast %29 : vector<1x8xf32> to vector<1x8x1xf32>
    %31 = vector.broadcast %30 : vector<1x8x1xf32> to vector<1x8x16xf32>
    %32 = arith.subf %28, %31 : vector<1x8x16xf32>
    %33 = math.exp %32 : vector<1x8x16xf32>
    %cst_14 = arith.constant dense<0.000000e+00> : vector<1x8xf32>
    %34 = vector.multi_reduction <add>, %33, %cst_14 [2] : vector<1x8x16xf32> to vector<1x8xf32>
    %35 = vector.shape_cast %34 : vector<1x8xf32> to vector<1x8x1xf32>
    %36 = tpu.reciprocal %35 {approx = true} : vector<1x8x1xf32> -> vector<1x8x1xf32>
    %37 = vector.broadcast %36 : vector<1x8x1xf32> to vector<1x8x16xf32>
    %38 = arith.mulf %33, %37 : vector<1x8x16xf32>
    %39 = arith.truncf %38 : vector<1x8x16xf32> to vector<1x8x16xbf16>
    "tpu.trace_start"() <{level = 10 : i32, message = "bqk,bkd->bqd"}> : () -> ()
    %cst_15 = arith.constant dense<0.000000e+00> : vector<1x8x64xf32>
    %40 = tpu.matmul %39, %15, %cst_15 {dimension_numbers = #tpu.dot_dimension_numbers<[2], [1], [1], [2], [0, 0, 0, 1, 1, 2], [0], [0]>} : vector<1x8x16xbf16>, vector<1x16x64xbf16>, vector<1x8x64xf32> -> vector<1x8x64xf32>
    "tpu.trace_stop"() : () -> ()
    %41 = arith.extui %22 : vector<1x1x64xi1> to vector<1x1x64xi32>
    %42 = arith.sitofp %41 : vector<1x1x64xi32> to vector<1x1x64xf32>
    %43 = vector.broadcast %42 : vector<1x1x64xf32> to vector<1x8x64xf32>
    %44 = arith.mulf %40, %43 : vector<1x8x64xf32>
    %45 = arith.addf %17, %44 : vector<1x8x64xf32>
    %c16_i32_16 = arith.constant 16 : i32
    %46 = vector.broadcast %c16_i32_16 : i32 to vector<1x1x64xi32>
    %47 = arith.cmpi sge, %16, %46 : vector<1x1x64xi32>
    %c32_i32 = arith.constant 32 : i32
    %48 = vector.broadcast %c32_i32 : i32 to vector<1x1x64xi32>
    %49 = arith.cmpi slt, %16, %48 : vector<1x1x64xi32>
    %50 = arith.andi %47, %49 : vector<1x1x64xi1>
    %51 = arith.extui %50 : vector<1x1x64xi1> to vector<1x1x64xi32>
    %52 = arith.sitofp %51 : vector<1x1x64xi32> to vector<1x1x64xf32>
    %53 = arith.truncf %52 : vector<1x1x64xf32> to vector<1x1x64xbf16>
    %54 = vector.broadcast %53 : vector<1x1x64xbf16> to vector<1x8x64xbf16>
    %55 = arith.mulf %9, %54 : vector<1x8x64xbf16>
    "tpu.trace_start"() <{level = 10 : i32, message = "bqd,bkd->bqk"}> : () -> ()
    %cst_17 = arith.constant dense<0.000000e+00> : vector<1x8x16xf32>
    %56 = tpu.matmul %55, %14, %cst_17 {dimension_numbers = #tpu.dot_dimension_numbers<[2], [2], [1], [1], [0, 0, 0, 1, 1, 1], [0], [0]>} : vector<1x8x64xbf16>, vector<1x16x64xbf16>, vector<1x8x16xf32> -> vector<1x8x16xf32>
    "tpu.trace_stop"() : () -> ()
    %cst_18 = arith.constant dense<0xFF800000> : vector<1x8xf32>
    %57 = vector.multi_reduction <maximumf>, %56, %cst_18 [2] : vector<1x8x16xf32> to vector<1x8xf32>
    %58 = vector.shape_cast %57 : vector<1x8xf32> to vector<1x8x1xf32>
    %59 = vector.broadcast %58 : vector<1x8x1xf32> to vector<1x8x16xf32>
    %60 = arith.subf %56, %59 : vector<1x8x16xf32>
    %61 = math.exp %60 : vector<1x8x16xf32>
    %cst_19 = arith.constant dense<0.000000e+00> : vector<1x8xf32>
    %62 = vector.multi_reduction <add>, %61, %cst_19 [2] : vector<1x8x16xf32> to vector<1x8xf32>
    %63 = vector.shape_cast %62 : vector<1x8xf32> to vector<1x8x1xf32>
    %64 = tpu.reciprocal %63 {approx = true} : vector<1x8x1xf32> -> vector<1x8x1xf32>
    %65 = vector.broadcast %64 : vector<1x8x1xf32> to vector<1x8x16xf32>
    %66 = arith.mulf %61, %65 : vector<1x8x16xf32>
    %67 = arith.truncf %66 : vector<1x8x16xf32> to vector<1x8x16xbf16>
    "tpu.trace_start"() <{level = 10 : i32, message = "bqk,bkd->bqd"}> : () -> ()
    %cst_20 = arith.constant dense<0.000000e+00> : vector<1x8x64xf32>
    %68 = tpu.matmul %67, %15, %cst_20 {dimension_numbers = #tpu.dot_dimension_numbers<[2], [1], [1], [2], [0, 0, 0, 1, 1, 2], [0], [0]>} : vector<1x8x16xbf16>, vector<1x16x64xbf16>, vector<1x8x64xf32> -> vector<1x8x64xf32>
    "tpu.trace_stop"() : () -> ()
    %69 = arith.extui %50 : vector<1x1x64xi1> to vector<1x1x64xi32>
    %70 = arith.sitofp %69 : vector<1x1x64xi32> to vector<1x1x64xf32>
    %71 = vector.broadcast %70 : vector<1x1x64xf32> to vector<1x8x64xf32>
    %72 = arith.mulf %68, %71 : vector<1x8x64xf32>
    %73 = arith.addf %45, %72 : vector<1x8x64xf32>
    %c32_i32_21 = arith.constant 32 : i32
    %74 = vector.broadcast %c32_i32_21 : i32 to vector<1x1x64xi32>
    %75 = arith.cmpi sge, %16, %74 : vector<1x1x64xi32>
    %c48_i32 = arith.constant 48 : i32
    %76 = vector.broadcast %c48_i32 : i32 to vector<1x1x64xi32>
    %77 = arith.cmpi slt, %16, %76 : vector<1x1x64xi32>
    %78 = arith.andi %75, %77 : vector<1x1x64xi1>
    %79 = arith.extui %78 : vector<1x1x64xi1> to vector<1x1x64xi32>
    %80 = arith.sitofp %79 : vector<1x1x64xi32> to vector<1x1x64xf32>
    %81 = arith.truncf %80 : vector<1x1x64xf32> to vector<1x1x64xbf16>
    %82 = vector.broadcast %81 : vector<1x1x64xbf16> to vector<1x8x64xbf16>
    %83 = arith.mulf %9, %82 : vector<1x8x64xbf16>
    "tpu.trace_start"() <{level = 10 : i32, message = "bqd,bkd->bqk"}> : () -> ()
    %cst_22 = arith.constant dense<0.000000e+00> : vector<1x8x16xf32>
    %84 = tpu.matmul %83, %14, %cst_22 {dimension_numbers = #tpu.dot_dimension_numbers<[2], [2], [1], [1], [0, 0, 0, 1, 1, 1], [0], [0]>} : vector<1x8x64xbf16>, vector<1x16x64xbf16>, vector<1x8x16xf32> -> vector<1x8x16xf32>
    "tpu.trace_stop"() : () -> ()
    %cst_23 = arith.constant dense<0xFF800000> : vector<1x8xf32>
    %85 = vector.multi_reduction <maximumf>, %84, %cst_23 [2] : vector<1x8x16xf32> to vector<1x8xf32>
    %86 = vector.shape_cast %85 : vector<1x8xf32> to vector<1x8x1xf32>
    %87 = vector.broadcast %86 : vector<1x8x1xf32> to vector<1x8x16xf32>
    %88 = arith.subf %84, %87 : vector<1x8x16xf32>
    %89 = math.exp %88 : vector<1x8x16xf32>
    %cst_24 = arith.constant dense<0.000000e+00> : vector<1x8xf32>
    %90 = vector.multi_reduction <add>, %89, %cst_24 [2] : vector<1x8x16xf32> to vector<1x8xf32>
    %91 = vector.shape_cast %90 : vector<1x8xf32> to vector<1x8x1xf32>
    %92 = tpu.reciprocal %91 {approx = true} : vector<1x8x1xf32> -> vector<1x8x1xf32>
    %93 = vector.broadcast %92 : vector<1x8x1xf32> to vector<1x8x16xf32>
    %94 = arith.mulf %89, %93 : vector<1x8x16xf32>
    %95 = arith.truncf %94 : vector<1x8x16xf32> to vector<1x8x16xbf16>
    "tpu.trace_start"() <{level = 10 : i32, message = "bqk,bkd->bqd"}> : () -> ()
    %cst_25 = arith.constant dense<0.000000e+00> : vector<1x8x64xf32>
    %96 = tpu.matmul %95, %15, %cst_25 {dimension_numbers = #tpu.dot_dimension_numbers<[2], [1], [1], [2], [0, 0, 0, 1, 1, 2], [0], [0]>} : vector<1x8x16xbf16>, vector<1x16x64xbf16>, vector<1x8x64xf32> -> vector<1x8x64xf32>
    "tpu.trace_stop"() : () -> ()
    %97 = arith.extui %78 : vector<1x1x64xi1> to vector<1x1x64xi32>
    %98 = arith.sitofp %97 : vector<1x1x64xi32> to vector<1x1x64xf32>
    %99 = vector.broadcast %98 : vector<1x1x64xf32> to vector<1x8x64xf32>
    %100 = arith.mulf %96, %99 : vector<1x8x64xf32>
    %101 = arith.addf %73, %100 : vector<1x8x64xf32>
    %c48_i32_26 = arith.constant 48 : i32
    %102 = vector.broadcast %c48_i32_26 : i32 to vector<1x1x64xi32>
    %103 = arith.cmpi sge, %16, %102 : vector<1x1x64xi32>
    %c64_i32 = arith.constant 64 : i32
    %104 = vector.broadcast %c64_i32 : i32 to vector<1x1x64xi32>
    %105 = arith.cmpi slt, %16, %104 : vector<1x1x64xi32>
    %106 = arith.andi %103, %105 : vector<1x1x64xi1>
    %107 = arith.extui %106 : vector<1x1x64xi1> to vector<1x1x64xi32>
    %108 = arith.sitofp %107 : vector<1x1x64xi32> to vector<1x1x64xf32>
    %109 = arith.truncf %108 : vector<1x1x64xf32> to vector<1x1x64xbf16>
    %110 = vector.broadcast %109 : vector<1x1x64xbf16> to vector<1x8x64xbf16>
    %111 = arith.mulf %9, %110 : vector<1x8x64xbf16>
    "tpu.trace_start"() <{level = 10 : i32, message = "bqd,bkd->bqk"}> : () -> ()
    %cst_27 = arith.constant dense<0.000000e+00> : vector<1x8x16xf32>
    %112 = tpu.matmul %111, %14, %cst_27 {dimension_numbers = #tpu.dot_dimension_numbers<[2], [2], [1], [1], [0, 0, 0, 1, 1, 1], [0], [0]>} : vector<1x8x64xbf16>, vector<1x16x64xbf16>, vector<1x8x16xf32> -> vector<1x8x16xf32>
    "tpu.trace_stop"() : () -> ()
    %cst_28 = arith.constant dense<0xFF800000> : vector<1x8xf32>
    %113 = vector.multi_reduction <maximumf>, %112, %cst_28 [2] : vector<1x8x16xf32> to vector<1x8xf32>
    %114 = vector.shape_cast %113 : vector<1x8xf32> to vector<1x8x1xf32>
    %115 = vector.broadcast %114 : vector<1x8x1xf32> to vector<1x8x16xf32>
    %116 = arith.subf %112, %115 : vector<1x8x16xf32>
    %117 = math.exp %116 : vector<1x8x16xf32>
    %cst_29 = arith.constant dense<0.000000e+00> : vector<1x8xf32>
    %118 = vector.multi_reduction <add>, %117, %cst_29 [2] : vector<1x8x16xf32> to vector<1x8xf32>
    %119 = vector.shape_cast %118 : vector<1x8xf32> to vector<1x8x1xf32>
    %120 = tpu.reciprocal %119 {approx = true} : vector<1x8x1xf32> -> vector<1x8x1xf32>
    %121 = vector.broadcast %120 : vector<1x8x1xf32> to vector<1x8x16xf32>
    %122 = arith.mulf %117, %121 : vector<1x8x16xf32>
    %123 = arith.truncf %122 : vector<1x8x16xf32> to vector<1x8x16xbf16>
    "tpu.trace_start"() <{level = 10 : i32, message = "bqk,bkd->bqd"}> : () -> ()
    %cst_30 = arith.constant dense<0.000000e+00> : vector<1x8x64xf32>
    %124 = tpu.matmul %123, %15, %cst_30 {dimension_numbers = #tpu.dot_dimension_numbers<[2], [1], [1], [2], [0, 0, 0, 1, 1, 2], [0], [0]>} : vector<1x8x16xbf16>, vector<1x16x64xbf16>, vector<1x8x64xf32> -> vector<1x8x64xf32>
    "tpu.trace_stop"() : () -> ()
    %125 = arith.extui %106 : vector<1x1x64xi1> to vector<1x1x64xi32>
    %126 = arith.sitofp %125 : vector<1x1x64xi32> to vector<1x1x64xf32>
    %127 = vector.broadcast %126 : vector<1x1x64xf32> to vector<1x8x64xf32>
    %128 = arith.mulf %124, %127 : vector<1x8x64xf32>
    %129 = arith.addf %101, %128 : vector<1x8x64xf32>
    %130 = arith.truncf %129 : vector<1x8x64xf32> to vector<1x8x64xbf16>
    %131 = vector.shape_cast %130 : vector<1x8x64xbf16> to vector<8x64xbf16>
    %c0_31 = arith.constant 0 : index
    %c0_32 = arith.constant 0 : index
    %132 = vector.load %arg5[%c0_31, %c0_32] : memref<32x64xbf16, #tpu.memory_space<vmem>>, vector<32x64xbf16>
    %cst_33 = arith.constant dense<0.000000e+00> : vector<8x32xf32>
    %133 = tpu.matmul %131, %132, %cst_33 {dimension_numbers = #tpu.dot_dimension_numbers<[1], [1], [0], [0], [0, 0, 1, 0], [], []>} : vector<8x64xbf16>, vector<32x64xbf16>, vector<8x32xf32> -> vector<8x32xf32>
    %c0_34 = arith.constant 0 : index
    %c0_35 = arith.constant 0 : index
    %134 = vector.load %arg6[%c0_34, %c0_35] : memref<1x32xf32, #tpu.memory_space<vmem>>, vector<1x32xf32>
    %135 = vector.broadcast %134 : vector<1x32xf32> to vector<8x32xf32>
    %136 = arith.addf %133, %135 : vector<8x32xf32>
    %137 = vector.shape_cast %136 : vector<8x32xf32> to vector<1x8x32xf32>
    %c0_36 = arith.constant 0 : index
    %c0_37 = arith.constant 0 : index
    %c0_38 = arith.constant 0 : index
    %138 = vector.load %arg7[%c0_36, %c0_37, %c0_38] : memref<1x8x32xf32, #tpu.memory_space<vmem>>, vector<1x8x32xf32>
    tpu.vector_store %arg7[%c0_36, %c0_37, %c0_38], %137 {strides = array<i32>} : memref<1x8x32xf32, #tpu.memory_space<vmem>>, vector<1x8x32xf32>,
    return
  }
  func.func @transform_0(%arg0: i32) -> (i32, i32, i32) {
    %c0_i32 = arith.constant 0 : i32
    %c0_i32_0 = arith.constant 0 : i32
    %c0_i32_1 = arith.constant 0 : i32
    return %arg0, %c0_i32, %c0_i32_0 : i32, i32, i32
  }
  func.func @transform_1(%arg0: i32) -> (i32, i32, i32) {
    %c0_i32 = arith.constant 0 : i32
    %c0_i32_0 = arith.constant 0 : i32
    %c0_i32_1 = arith.constant 0 : i32
    return %arg0, %c0_i32, %c0_i32_0 : i32, i32, i32
  }
  func.func @transform_2(%arg0: i32) -> (i32, i32) {
    %c0_i32 = arith.constant 0 : i32
    %c0_i32_0 = arith.constant 0 : i32
    %c0_i32_1 = arith.constant 0 : i32
    return %c0_i32, %c0_i32_0 : i32, i32
  }
  func.func @transform_3(%arg0: i32) -> (i32, i32) {
    %c0_i32 = arith.constant 0 : i32
    %c0_i32_0 = arith.constant 0 : i32
    %c0_i32_1 = arith.constant 0 : i32
    return %c0_i32, %c0_i32_0 : i32, i32
  }
  func.func @transform_4(%arg0: i32) -> (i32, i32) {
    %c0_i32 = arith.constant 0 : i32
    %c0_i32_0 = arith.constant 0 : i32
    %c0_i32_1 = arith.constant 0 : i32
    return %c0_i32, %c0_i32_0 : i32, i32
  }
  func.func @transform_5(%arg0: i32) -> (i32, i32) {
    %c0_i32 = arith.constant 0 : i32
    %c0_i32_0 = arith.constant 0 : i32
    %c0_i32_1 = arith.constant 0 : i32
    return %c0_i32, %c0_i32_0 : i32, i32
  }
  func.func @transform_6(%arg0: i32) -> (i32, i32, i32) {
    %c0_i32 = arith.constant 0 : i32
    %c0_i32_0 = arith.constant 0 : i32
    %c0_i32_1 = arith.constant 0 : i32
    return %arg0, %c0_i32, %c0_i32_0 : i32, i32, i32
  }
}

</mosaic_0001>

<bundles_post_ra>
// kernel: tpu_custom_call.1
= control target key start
LH: loop header
LB: loop body
LE: loop exit
PB: predicated region body
PF: predicated region fallthrough
CT: control target
= control target key end

     0   :  { %11 = vsyncpa [#allocation3], 0  ;;  %s1700_s0 = inlined_call_operand.vmem [shape: bf16[2,8,32], index: 0, kind: input, shape index: {}]   ;;  %s1701_s1 = inlined_call_operand.vmem [shape: bf16[2,16,32], index: 1, kind: input, shape index: {}]   ;;  %s1702_s2 = inlined_call_operand.vmem [shape: bf16[64,32], index: 2, kind: input, shape index: {}]   ;;  %s1703_s3 = inlined_call_operand.vmem [shape: bf16[128,32], index: 3, kind: input, shape index: {}]   ;;  %s1704_s4 = inlined_call_operand.vmem [shape: bf16[32,64], index: 4, kind: input, shape index: {}]   ;;  %s1705_s5 = inlined_call_operand.vmem [shape: f32[1,32], index: 5, kind: input, shape index: {}]   ;;  %s1706_s6 = inlined_call_operand.hbm [shape: f32[2,8,32], index: 6, kind: output, shape index: {}]  }
   0x1   :  { %13 = vsyncpa [#allocation3 + $0x1], 0  ;;  %s1424_s21 = smov 0   ;;  %s1426_s22 = smov 0  }
   0x2   :  { %s1428_s23 = smov 0   ;;  %s1430_s24 = smov 0  }
   0x3 LB: > { %s1445_s25 = sadd.s32 4294967295, %s1383_s24   ;;  %s1083_s26 = sadd.s32 4294967294, %s1383_s24   ;;  %s1383_s24 = sphi %s1430_s24, %s1712_s24   ;;  %s1379_s23 = sphi %s1428_s23, %s1711_s23   ;;  %s1375_s22 = sphi %s1426_s22, %s1710_s22   ;;  %s1371_s21 = sphi %s1424_s21, %s1709_s21  }
   0x4   : > { %s1449_s27 = sadd.s32 1, %s1383_s24   ;;  %s162_s28 = sadd.s32 1, %s1379_s23 }
   0x5   : > { %s159_s29 = ssub.s32 %s1383_s24, %s1449_s27  ;;  %p172_p0 = scmp.ne.s32.totalorder %s1379_s23, %s1375_s22 }
   0x6   : > { %p160_p1 = scmp.eq.s32.totalorder %s159_s29, 0  ;;  %p173_p2 = scmp.eq.s32.totalorder %s1445_s25, 1 }
   0x7   : > { %p178_p3 = scmp.ne.s32.totalorder %s1375_s22, %s1371_s21  ;;  %p179_p4 = scmp.eq.s32.totalorder %s1083_s26, 1 }
   0x8   : > { %s1460_s30 = scalar_select %p160_p1, %s1379_s23, %s162_s28  }
   0x9   : > { %p1462_p5 = por %p173_p2, %p172_p0  ;;  %p1466_p6 = por %p179_p4, %p178_p3 }
   0xa   : > { %p1086_p7 = scmp.ge.s32.totalorder %s1383_s24, 1  ;;  %p224_p8 = scmp.lt.s32.totalorder %s1383_s24, 3 }
   0xc   : > { %p225_p9 = pnand %p1086_p7, %p224_p8 }
   0xd   : > { %vm299_vm0 = vcmask (!%p225_p9), 261120   ;;  %v1385_v0 = vmov (!%p225_p9), 0.0   ;;  %v1290_v1 = vld [vmem:[%s1703_s3] sm:$0xff] (!%p225_p9)   ;;  %vm1386_vm1 = vmmov (!%p225_p9), 0   ;;  %v1291_v3 = vld [vmem:[%s1703_s3 + $0x8] sm:$0xff] (!%p225_p9)   ;;  %p258_p10 = scmp.lt.s32.totalorder (!%p225_p9), %s1445_s25, 1  ;;  %v487_v31 = vlaneseq (!%p225_p9) }
   0xe   : > { %228 = sbr.rel (%p225_p9) target bundleno = 2357 (0x935), region = 44  ;;  %1172 = vmatprep.subr.bf16.mxu1 (!%p225_p9), %v1385_v0  ;;  %1160 = vmatprep.subr.bf16.mxu0 (!%p225_p9), %v1385_v0  ;;  %v422_v2 = vsel (!%p225_p9), %vm299_vm0, %v1290_v1, 0  ;;  %v1295_v4 = vld [vmem:[%s1702_s2] sm:$0xff] (!%p225_p9)   ;;  %v425_v6 = vsel (!%p225_p9), %vm299_vm0, %v1291_v3, 0  ;;  %v1297_v7 = vld [vmem:[%s1702_s2 + $0x8] sm:$0xff] (!%p225_p9)   ;;  %v1292_v8 = vld [vmem:[%s1703_s3 + $0x10] sm:$0xff] (!%p225_p9)  }
   0xf   : > { %1188 = vmatprep.mubr.msk.bf16.mxu1 (!%p225_p9), %vm1386_vm1, %v1385_v0  ;;  %1168 = vmatprep.mubr.msk.bf16.mxu0 (!%p225_p9), %vm1386_vm1, %v1385_v0  ;;  %v304_v5 = vsel (!%p225_p9), %vm299_vm0, %v1295_v4, 0  ;;  %v307_v9 = vsel (!%p225_p9), %vm299_vm0, %v1297_v7, 0  ;;  %v428_v10 = vsel (!%p225_p9), %vm299_vm0, %v1292_v8, 0  ;;  %v1299_v11 = vld [vmem:[%s1702_s2 + $0x10] sm:$0xff] (!%p225_p9)   ;;  %v1293_v12 = vld [vmem:[%s1703_s3 + $0x18] sm:$0xff] (!%p225_p9)   ;;  %v1294_v16 = vld [vmem:[%s1703_s3 + $0x20] sm:$0xff] (!%p225_p9)  }
  0x10   : > { %1173 = vmatpush3.bf16.xpose.msra.mxu1 (!%p225_p9), %v422_v2  ;;  %1161 = vmatpush3.bf16.xpose.msra.mxu0 (!%p225_p9), %v304_v5  ;;  %v310_v13 = vsel (!%p225_p9), %vm299_vm0, %v1299_v11, 0  ;;  %v431_v14 = vsel (!%p225_p9), %vm299_vm0, %v1293_v12, 0  ;;  %v1301_v15 = vld [vmem:[%s1702_s2 + $0x18] sm:$0xff] (!%p225_p9)   ;;  %v434_v18 = vsel (!%p225_p9), %vm299_vm0, %v1294_v16, 0  ;;  %v1296_v19 = vld [vmem:[%s1703_s3 + $0x28] sm:$0xff] (!%p225_p9)   ;;  %v1298_v22 = vld [vmem:[%s1703_s3 + $0x30] sm:$0xff] (!%p225_p9)  }
  0x11   : > { %1174 = vmatprep.subr.bf16.mxu1 (!%p225_p9), %v1385_v0  ;;  %1162 = vmatprep.subr.bf16.mxu0 (!%p225_p9), %v1385_v0  ;;  %v313_v17 = vsel (!%p225_p9), %vm299_vm0, %v1301_v15, 0  ;;  %v437_v21 = vsel (!%p225_p9), %vm299_vm0, %v1296_v19, 0  ;;  %v440_v23 = vsel (!%p225_p9), %vm299_vm0, %v1298_v22, 0  ;;  %v1300_v24 = vld [vmem:[%s1703_s3 + $0x38] sm:$0xff] (!%p225_p9)   ;;  %v1555_v32 = vand.u32 (!%p225_p9), 127, %v487_v31  ;;  %s1123_s28 = sshll.u32 (!%p225_p9), %s1445_s25, 7 }
  0x12   : > { %v443_v25 = vsel (!%p225_p9), %vm299_vm0, %v1300_v24, 0  ;;  %vm496_vm3 = vcmask (!%p225_p9), 523264   ;;  %vm543_vm4 = vcmask (!%p225_p9), 130048   ;;  %s1657_s12 = scalar_lea.hbm (!%p225_p9), %s1706_s6, %s1123_s28  ;;  %s1388_s13 = smov (!%p225_p9), [#allocation2]  }
  0x13   : > { %vm490_vm2 = vcmp.lt.s32.totalorder (!%p225_p9), %v1555_v32, 16  ;;  %vm605_vm5 = vcmp.ge.s32.totalorder (!%p225_p9), %v1555_v32, 16  ;;  %vm606_vm6 = vcmp.lt.s32.totalorder (!%p225_p9), %v1555_v32, 32  ;;  %vm712_vm8 = vcmp.ge.s32.totalorder (!%p225_p9), %v1555_v32, 32  ;;  %s1325_s14 = sshll.u32 (!%p225_p9), %s1388_s13, 4  ;;  %s1326_s14 = int_to_ptr.vmem [resolvable:$false] %s1325_s14 }
  0x14   : > { %v1559_v37 = vsel (!%p225_p9), %vm490_vm2, 1.0, %v1385_v0  ;;  %vm607_vm7 = vmand (!%p225_p9), %vm605_vm5, %vm606_vm6  ;;  %vm713_vm9 = vcmp.lt.s32.totalorder (!%p225_p9), %v1555_v32, 48  ;;  %vm819_vm11 = vcmp.ge.s32.totalorder (!%p225_p9), %v1555_v32, 48  ;;  %vm820_vm12 = vcmp.lt.s32.totalorder (!%p225_p9), %v1555_v32, 64  ;;  %s1327_s15 = scalar_lea.vmem (!%p225_p9), %s1326_s14, 256 }
  0x15   : > { %s259_s17 = scalar_select %p258_p10, %s1445_s25, 1  ;;  %v494_v42 = vpack.c.bf16 %v1559_v37, %v1559_v37  ;;  %v1109_v59 = vsel %vm607_vm7, 1.0, %v1385_v0  ;;  %vm714_vm10 = vmand %vm712_vm8, %vm713_vm9 }
  0x16   : > { %v610_v60 = vpack.c.bf16 %v1109_v59, %v1109_v59  ;;  %vm821_vm13 = vmand %vm819_vm11, %vm820_vm12 }
  0x17   : > { %s1126_s20 = sshll.u32 %s259_s17, 3  ;;  %s1088_s18 = sshll.u32 %s259_s17, 2 }
  0x18   : > { %1175 = vmatpush3.bf16.xpose.msra.mxu1 %v425_v6  ;;  %s1505_s29 = scalar_lea.vmem %s1701_s1, %s1126_s20  ;;  %1163 = vmatpush3.bf16.xpose.msra.mxu0 %v307_v9  ;;  %s261_s26 = scalar_lea.vmem %s1700_s0, %s1088_s18 }
  0x19   : > { %1176 = vmatprep.subr.bf16.mxu1 %v1385_v0  ;;  %1164 = vmatprep.subr.bf16.mxu0 %v1385_v0  ;;  %v268_v20 = vld [vmem:[%s261_s26] sm:$0xf]  ;;  %s255_s18 = sand.u32 1, %s1375_s22  }
  0x1a   : > { %v1302_v26 = vld [vmem:[%s1505_s29] sm:$0xff]   ;;  %s1387_s29 = smov 64   ;;  %s1087_s19 = sshll.u32 %s255_s18, 3 }
  0x1b   : > { %s257_s9 = scalar_lea.vmem [#allocation2], %s1087_s19  ;;  %s999_s25 = scalar_lea.sflag [#allocation3], %s255_s18 }
  0x1c   : > { %s1012_s17 = sshll.u32 %s257_s9, 4  ;;  %s1659_s17 = int_to_ptr.vmem [resolvable:$true] %s1012_s17 }
  0x1d   : > { %p1328_p0 = scmp.lt.s32.totalorder %s1659_s17, %s1326_s14 }
  0x20   : > { %1177 = vmatpush3.bf16.xpose.msra.mxu1 %v428_v10  ;;  %1165 = vmatpush3.bf16.xpose.msra.mxu0 %v310_v13 }
  0x21   : > { %1178 = vmatprep.subr.bf16.mxu1 %v1385_v0  ;;  %1166 = vmatprep.subr.bf16.mxu0 %v1385_v0 }
  0x28   : > { %1179 = vmatpush3.bf16.xpose.msra.mxu1 %v431_v14  ;;  %1167 = vmatpush3.bf16.xpose.msra.mxu0 %v313_v17  ;;  %v1601_v17 = vsel %vm714_vm10, 1.0, %v1385_v0 }
  0x29   : > { %1180 = vmatprep.subr.bf16.mxu1 %v1385_v0  ;;  %1198 = vmatprep.subr.bf16.mxu0 %v1385_v0 }
  0x2f   : > { %1169 = vmatmul.mubr.msk.bf16.vlgmr.msra.gmra.mrb[0].mxu0 %vm299_vm0, %v268_v20  ;;  %v1614_v20 = vsel %vm821_vm13, 1.0, %v1385_v0 }
  0x30   : > { %1181 = vmatpush3.bf16.xpose.msra.mxu1 %v434_v18  ;;  %1200 = vmatprep.mubr.msk.bf16.mxu0 %vm1386_vm1, %v1385_v0  ;;  %v717_v18 = vpack.c.bf16 %v1601_v17, %v1601_v17 }
  0x31   : > { %1182 = vmatprep.subr.bf16.mxu1 %v1385_v0 }
  0x38   : > { %1183 = vmatpush3.bf16.xpose.msra.mxu1 %v437_v21  ;;  %v824_v21 = vpack.c.bf16 %v1614_v20, %v1614_v20 }
  0x39   : > { %1184 = vmatprep.subr.bf16.mxu1 %v1385_v0 }
  0x40   : > { %1185 = vmatpush3.bf16.xpose.msra.mxu1 %v440_v23 }
  0x41   : > { %1186 = vmatprep.subr.bf16.mxu1 %v1385_v0 }
  0x48   : > { %1187 = vmatpush3.bf16.xpose.msra.mxu1 %v443_v25 }
  0x49   : > { %1192 = vmatprep.subr.bf16.mxu1 %v1385_v0 }
  0x4f   : > { %1189 = vmatmul.mubr.msk.bf16.vlgmr.msra.gmra.mrb[0].mxu1 %vm299_vm0, %v1302_v26 }
  0x50   : > { %1194 = vmatprep.mubr.msk.bf16.mxu1 %vm1386_vm1, %v1385_v0 }
 0x102   : > { %v349_v27 = vpop.f32.mrb[0].mxu0 }
 0x103   : > { %v1170_v28 = vpop.f32.mrb[1].mxu0  ;;  %v355_v35 = vmul.f32 0.25, %v349_v27 }
 0x104   : > { %v352_v29 = vpop.f32.mrb[2].mxu0 }
 0x105   : > { %v1171_v30 = vpop.f32.mrb[3].mxu0  ;;  %v1564_v41 = vpack.c.bf16 %v355_v35, %v355_v35 }
 0x107   : > { %v495_v43 = vmul.bf16 %v494_v42, %v1564_v41  ;;  %v611_v61 = vmul.bf16 %v610_v60, %v1564_v41  ;;  %v718_v19 = vmul.bf16 %v717_v18, %v1564_v41  ;;  %v825_v22 = vmul.bf16 %v824_v21, %v1564_v41 }
 0x122   : > { %v479_v33 = vpop.f32.mrb[0].mxu1 }
 0x123   : > { %v1190_v34 = vpop.f32.mrb[1].mxu1 }
 0x124   : > { %v482_v36 = vpop.f32.mrb[2].mxu1 }
 0x125   : > { %v486_v38 = vpack.c.bf16 %v482_v36, %v479_v33  ;;  %v1191_v39 = vpop.f32.mrb[3].mxu1 }
 0x127   : > { %v1562_v40 = vsel %vm496_vm3, %v486_v38, 0  ;;  %557 = vrot.lane.b32.xlu1 %v486_v38, %s1387_s29  ;;  %s1321_s29 = scalar_lea.vmem %s1659_s17, 128 }
 0x128   : > { %1193 = vmatpush3.bf16.xpose.msra.mxu1 %v1562_v40  ;;  %p1322_p11 = scmp.ne.s32.totalorder %s1659_s17, %s1321_s29  ;;  %p1329_p1 = scmp.lt.s32.totalorder %s1327_s15, %s1321_s29 }
 0x129   : > { %1222 = vmatprep.subr.bf16.mxu1 %v1385_v0 }
 0x12a   : > { %p1323_p12 = pnand %p1322_p11, %p1462_p5  ;;  %p1330_p2 = por %p1329_p1, %p1328_p0 }
 0x12c   : > { %p1324_p13 = pneg %p1323_p12 }
 0x12e   : > { %p1331_p3 = pnand %p1330_p2, %p1324_p13 }
 0x12f   : > { %1195 = vmatmul.mubr.msk.bf16.vlgmr.msra.gmra.mrb[4].mxu1 %vm496_vm3, %v495_v43 }
 0x130   : > { %1224 = vmatprep.mubr.msk.bf16.mxu1 %vm1386_vm1, %v1385_v0 }
 0x199   : > { %v1574_v44 = vpop.permute.xlu1 %557 }
 0x19a   : > { %1199 = vmatpush3.bf16.msra.mxu0 %v1574_v44  ;;  %1223 = vmatpush3.bf16.msra.mxu1 %v1574_v44 }
 0x19b   : > { %1204 = vmatprep.subr.bf16.mxu0 %v1385_v0  ;;  %1234 = vmatprep.subr.bf16.mxu1 %v1385_v0 }
 0x202   : > { %v537_v45 = vpop.f32.mrb[4].mxu1 }
 0x203   : > { %v1196_v46 = vpop.f32.mrb[5].mxu1  ;;  %v544_v47 = vsel %vm543_vm4, %v537_v45, -inf }
 0x204   : > { %545 = vmax.xlane.f32.xlu0 %v544_v47  ;;  %v540_v48 = vpop.f32.mrb[6].mxu1 }
 0x205   : > { %v1197_v49 = vpop.f32.mrb[7].mxu1 }
 0x291   : > { %v546_v50 = vpop.xlane.xlu0 %545 }
 0x292   : > { %v547_v51 = vsub.f32 %v537_v45, %v546_v50 }
 0x294   : > { %v548_v52 = vmul.f32 1.442695, %v547_v51 }
 0x296   : > { %1305 = vpow2.f32 %v548_v52 }
 0x2a0   : > { %v1306_v53 = vpop.eup %1305 }
 0x2a1   : > { %v550_v54 = vsel %vm543_vm4, %v1306_v53, 0.0 }
 0x2a2   : > { %551 = vadd.xlane.f32.xlu0 %v550_v54 }
 0x32f   : > { %v552_v55 = vpop.xlane.xlu0 %551 }
 0x330   : > { %1307 = vrcp.f32 %v552_v55 }
 0x33a   : > { %v1308_v56 = vpop.eup %1307 }
 0x33b   : > { %v554_v57 = vmul.f32 %v1308_v56, %v1306_v53 }
 0x33d   : > { %v555_v58 = vpack.c.bf16 %v554_v57, %v554_v57 }
 0x33f   : > { %1201 = vmatmul.mubr.msk.bf16.vlgmr.msra.gmra.mrb[4].mxu0 %vm543_vm4, %v555_v58 }
 0x340   : > { %1205 = vmatpush3.bf16.xpose.msra.mxu0 %v1562_v40  ;;  %1206 = vmatprep.mubr.msk.bf16.mxu0 %vm1386_vm1, %v1385_v0 }
 0x341   : > { %1210 = vmatprep.subr.bf16.mxu0 %v1385_v0 }
 0x347   : > { %1207 = vmatmul.mubr.msk.bf16.vlgmr.msra.gmra.mrb[8].mxu0 %vm496_vm3, %v611_v61 }
 0x348   : > { %1211 = vmatpush3.bf16.msra.mxu0 %v1574_v44  ;;  %1212 = vmatprep.mubr.msk.bf16.mxu0 %vm1386_vm1, %v1385_v0 }
 0x349   : > { %1216 = vmatprep.subr.bf16.mxu0 %v1385_v0 }
 0x412   : > { %v597_v62 = vpop.f32.mrb[4].mxu0 }
 0x413   : > { %v1202_v63 = vpop.f32.mrb[5].mxu0  ;;  %v603_v24 = vmul.f32 %v1559_v37, %v597_v62 }
 0x414   : > { %v600_v1 = vpop.f32.mrb[6].mxu0 }
 0x415   : > { %v1203_v2 = vpop.f32.mrb[7].mxu0 }
 0x41a   : > { %v649_v3 = vpop.f32.mrb[8].mxu0 }
 0x41b   : > { %v1208_v4 = vpop.f32.mrb[9].mxu0  ;;  %v655_v5 = vsel %vm543_vm4, %v649_v3, -inf }
 0x41c   : > { %656 = vmax.xlane.f32.xlu1 %v655_v5  ;;  %v652_v6 = vpop.f32.mrb[10].mxu0 }
 0x41d   : > { %v1209_v7 = vpop.f32.mrb[11].mxu0 }
 0x4a9   : > { %v657_v8 = vpop.xlane.xlu1 %656 }
 0x4aa   : > { %v658_v9 = vsub.f32 %v649_v3, %v657_v8 }
 0x4ac   : > { %v659_v10 = vmul.f32 1.442695, %v658_v9 }
 0x4ae   : > { %1309 = vpow2.f32 %v659_v10 }
 0x4b8   : > { %v1310_v11 = vpop.eup %1309 }
 0x4b9   : > { %v661_v12 = vsel %vm543_vm4, %v1310_v11, 0.0 }
 0x4ba   : > { %662 = vadd.xlane.f32.xlu0 %v661_v12 }
 0x547   : > { %v663_v13 = vpop.xlane.xlu0 %662 }
 0x548   : > { %1311 = vrcp.f32 %v663_v13 }
 0x552   : > { %v1312_v14 = vpop.eup %1311 }
 0x553   : > { %v665_v15 = vmul.f32 %v1312_v14, %v1310_v11  ;;  %v1118_v11 = vld [vmem:[%s1705_s5] ss:$0 sm:$0xff] }
 0x555   : > { %v666_v16 = vpack.c.bf16 %v665_v15, %v665_v15 }
 0x557   : > { %1213 = vmatmul.mubr.msk.bf16.vlgmr.msra.gmra.mrb[12].mxu0 %vm543_vm4, %v666_v16 }
 0x558   : > { %1217 = vmatpush3.bf16.xpose.msra.mxu0 %v1562_v40  ;;  %1218 = vmatprep.mubr.msk.bf16.mxu0 %vm1386_vm1, %v1385_v0 }
 0x559   : > { %1228 = vmatprep.subr.bf16.mxu0 %v1385_v0 }
 0x55f   : > { %1219 = vmatmul.mubr.msk.bf16.vlgmr.msra.gmra.mrb[16].mxu0 %vm496_vm3, %v718_v19 }
 0x560   : > { %1229 = vmatpush3.bf16.xpose.msra.mxu0 %v1562_v40  ;;  %1230 = vmatprep.mubr.msk.bf16.mxu0 %vm1386_vm1, %v1385_v0 }
 0x561   : > { %1240 = vmatprep.subr.bf16.mxu0 %v1385_v0 }
 0x567   : > { %1231 = vmatmul.mubr.msk.bf16.vlgmr.msra.gmra.mrb[20].mxu0 %vm496_vm3, %v825_v22 }
 0x568   : > { %1244 = vmatprep.mubr.msk.bf16.mxu0 %vm1386_vm1, %v1385_v0 }
 0x62a   : > { %v704_v23 = vpop.f32.mrb[12].mxu0 }
 0x62b   : > { %v710_v25 = vmul.f32 %v1109_v59, %v704_v23  ;;  %v1214_v26 = vpop.f32.mrb[13].mxu0  ;;  %v1303_v59 = vld [vmem:[%s1704_s4] sm:$0xff]  }
 0x62c   : > { %v707_v27 = vpop.f32.mrb[14].mxu0  ;;  %v952_v60 = vsel %vm496_vm3, %v1303_v59, 0 }
 0x62d   : > { %v711_v28 = vadd.f32 %v710_v25, %v603_v24  ;;  %v1215_v29 = vpop.f32.mrb[15].mxu0  ;;  %1241 = vmatpush3.bf16.xpose.msra.mxu0 %v952_v60 }
 0x62e   : > { %1242 = vmatprep.subr.bf16.mxu0 %v1385_v0 }
 0x632   : > { %v756_v30 = vpop.f32.mrb[16].mxu0 }
 0x633   : > { %v1220_v31 = vpop.f32.mrb[17].mxu0  ;;  %v762_v32 = vsel %vm543_vm4, %v756_v30, -inf }
 0x634   : > { %763 = vmax.xlane.f32.xlu0 %v762_v32  ;;  %v759_v33 = vpop.f32.mrb[18].mxu0 }
 0x635   : > { %v1221_v34 = vpop.f32.mrb[19].mxu0 }
 0x63a   : > { %v863_v35 = vpop.f32.mrb[20].mxu0 }
 0x63b   : > { %v1232_v36 = vpop.f32.mrb[21].mxu0  ;;  %v869_v38 = vsel %vm543_vm4, %v863_v35, -inf }
 0x63c   : > { %870 = vmax.xlane.f32.xlu0 %v869_v38  ;;  %v866_v39 = vpop.f32.mrb[22].mxu0 }
 0x63d   : > { %v1233_v40 = vpop.f32.mrb[23].mxu0 }
 0x6c1   : > { %v764_v37 = vpop.xlane.xlu0 %763 }
 0x6c2   : > { %v765_v41 = vsub.f32 %v756_v30, %v764_v37 }
 0x6c4   : > { %v766_v42 = vmul.f32 1.442695, %v765_v41 }
 0x6c6   : > { %1313 = vpow2.f32 %v766_v42 }
 0x6c9   : > { %v871_v43 = vpop.xlane.xlu0 %870 }
 0x6ca   : > { %v872_v45 = vsub.f32 %v863_v35, %v871_v43 }
 0x6cc   : > { %v873_v46 = vmul.f32 1.442695, %v872_v45 }
 0x6ce   : > { %1315 = vpow2.f32 %v873_v46 }
 0x6d0   : > { %v1314_v47 = vpop.eup %1313 }
 0x6d1   : > { %v768_v48 = vsel %vm543_vm4, %v1314_v47, 0.0 }
 0x6d2   : > { %769 = vadd.xlane.f32.xlu0 %v768_v48 }
 0x6d8   : > { %v1316_v49 = vpop.eup %1315 }
 0x6d9   : > { %v875_v50 = vsel %vm543_vm4, %v1316_v49, 0.0 }
 0x6da   : > { %876 = vadd.xlane.f32.xlu0 %v875_v50 }
 0x75f   : > { %v770_v51 = vpop.xlane.xlu0 %769 }
 0x760   : > { %1317 = vrcp.f32 %v770_v51 }
 0x767   : > { %v877_v52 = vpop.xlane.xlu0 %876 }
 0x768   : > { %1319 = vrcp.f32 %v877_v52 }
 0x76a   : > { %v1318_v53 = vpop.eup %1317 }
 0x76b   : > { %v772_v54 = vmul.f32 %v1318_v53, %v1314_v47 }
 0x76d   : > { %v773_v55 = vpack.c.bf16 %v772_v54, %v772_v54 }
 0x76f   : > { %1225 = vmatmul.mubr.msk.bf16.vlgmr.msra.gmra.mrb[8].mxu1 %vm543_vm4, %v773_v55 }
 0x770   : > { %1235 = vmatpush3.bf16.msra.mxu1 %v1574_v44  ;;  %1236 = vmatprep.mubr.msk.bf16.mxu1 %vm1386_vm1, %v1385_v0  ;;  %v1304_v44 = vld [vmem:[%s1704_s4 + $0x8] sm:$0xff]  }
 0x771   : > { %v955_v61 = vsel %vm496_vm3, %v1304_v44, 0 }
 0x772   : > { %v1320_v56 = vpop.eup %1319  ;;  %1243 = vmatpush3.bf16.xpose.msra.mxu0 %v955_v61 }
 0x773   : > { %v879_v57 = vmul.f32 %v1320_v56, %v1316_v49 }
 0x775   : > { %v880_v58 = vpack.c.bf16 %v879_v57, %v879_v57 }
 0x777   : > { %1237 = vmatmul.mubr.msk.bf16.vlgmr.msra.gmra.mrb[12].mxu1 %vm543_vm4, %v880_v58 }
 0x842   : > { %v811_v62 = vpop.f32.mrb[8].mxu1 }
 0x843   : > { %v817_v63 = vmul.f32 %v1601_v17, %v811_v62  ;;  %v1226_v1 = vpop.f32.mrb[9].mxu1 }
 0x844   : > { %v814_v2 = vpop.f32.mrb[10].mxu1 }
 0x845   : > { %v818_v3 = vadd.f32 %v817_v63, %v711_v28  ;;  %v1227_v4 = vpop.f32.mrb[11].mxu1 }
 0x84a   : > { %v918_v5 = vpop.f32.mrb[12].mxu1 }
 0x84b   : > { %v924_v6 = vmul.f32 %v1614_v20, %v918_v5  ;;  %v1238_v0 = vpop.f32.mrb[13].mxu1 }
 0x84c   : > { %v921_v7 = vpop.f32.mrb[14].mxu1 }
 0x84d   : > { %v925_v8 = vadd.f32 %v924_v6, %v818_v3  ;;  %v1239_v9 = vpop.f32.mrb[15].mxu1 }
 0x84f   : > { %v926_v10 = vpack.c.bf16 %v925_v8, %v925_v8 }
 0x851   : > { %1245 = vmatmul.mubr.msk.bf16.vlgmr.msra.gmra.mrb[24].mxu0 %vm496_vm3, %v926_v10 }
 0x924   : > { %v991_v12 = vpop.f32.mrb[24].mxu0 }
 0x925   : > { %v992_v13 = vadd.f32 %v1118_v11, %v991_v12  ;;  %v1246_v14 = vpop.f32.mrb[25].mxu0 }
 0x926   : > { %v994_v15 = vpop.f32.mrb[26].mxu0 }
 0x927   : > { %v1247_v16 = vpop.f32.mrb[27].mxu0  ;;  %997 = vst.msk [vmem:[%s257_s9] sm:$0xff] %vm299_vm0, %v992_v13 }
 0x928   : > { %1334 = shalt.err (!%p1331_p3)
}
 0x929   : > { %s1335_s16 = scalar_lea.hbm %s1657_s12, 128  ;;  %s1339_s20 = scalar_lea.hbm %s1706_s6, 256 }
 0x92a   : > { %p1336_p4 = scmp.ne.s32.totalorder %s1657_s12, %s1335_s16  ;;  %p1340_p9 = scmp.lt.u32.totalorder %s1657_s12, %s1706_s6 }
 0x92b   : > { %p1341_p10 = scmp.lt.u32.totalorder %s1339_s20, %s1335_s16  ;;  %p1343_p12 = scmp.lt.u32.totalorder %s1335_s16, %s1657_s12 }
 0x92c   : > { %p1337_p7 = pnand %p1336_p4, %p1462_p5 }
 0x92d   : > { %p1342_p11 = por %p1341_p10, %p1340_p9 }
 0x92e   : > { %p1338_p8 = pneg %p1337_p7 }
 0x92f   : > { %p1344_p13 = por %p1343_p12, %p1342_p11 }
 0x931   : > { %p1345_p0 = pnand %p1344_p13, %p1338_p8 }
 0x933   : > { %1348 = shalt.err (!%p1345_p0)
}
 0x934   : > { %1248 = dma.vmem_to_hbm [thread:$0]  (%p1462_p5), %s1659_s17, 128, %s1657_s12, %s999_s25  }
 0x935 PF: > { %p1254_p1 = scmp.ge.s32.totalorder %s1383_s24, 2  ;;  %s1024_s9 = sand.u32 1, %s1371_s21  }
 0x936   : > { %s1025_s10 = scalar_lea.sflag [#allocation3], %s1024_s9 }
 0x937   : > { %p1251_p2 = pnand %p1254_p1, %p1466_p6 }
 0x939   : > { %1366 = dma.done.wait (!%p1251_p2), %s1025_s10, 128  }
 0x93a   : > { %1368 = vsyncadd (!%p1251_p2), %s1025_s10, 4294967168  ;;  %p16_p3 = scmp.ge.s32.totalorder %s1449_s27, 4   ;;  %s1709_s21 = smov %s1375_s22 }
 0x93b   : > { %s1710_s22 = smov %s1379_s23  ;;  %s1711_s23 = smov %s1460_s30 }
 0x93c   : > { %s1712_s24 = smov %s1449_s27  ;;  %18 = sbr.rel (!%p16_p3) target bundleno = 3 (0x3), region = 82 }
 0x943   :  { %1030 = vsyncpa [#allocation3], 1 }
 0x944   :  { %1032 = vsyncpa [#allocation3 + $0x1], 1 }

</bundles_post_ra>
